<compile_context>
chip_gen: v7x
topology: tpu7x:2x2x1
jax: 0.10.0
libtpu: 0.0.40
codegen_flags: <defaults>
</compile_context>

<pallas_src>
import jax
import jax.numpy as jnp
from jax.experimental import pallas as pl
from jax.experimental.pallas import tpu as pltpu

LANE = 128
BF16_SUBLANE = 16   # bf16 packs 16 rows per vreg sublane group


def _cdiv(a, b):
    return (a + b - 1) // b


def _round_up(x, m):
    return _cdiv(x, m) * m


# ------------------------------ Pallas kernels ------------------------------

def _matmul_bias_relu_kernel(x_ref, w_ref, b_ref, o_ref):
    # MXU matmul (bf16 x bf16 -> f32 accumulate); bias-add + ReLU epilogue in f32.
    acc = jnp.dot(x_ref[...], w_ref[...], preferred_element_type=jnp.float32)
    o_ref[...] = jnp.maximum(acc + b_ref[...], 0.0).astype(o_ref.dtype)


def _matmul_bias_kernel(x_ref, w_ref, b_ref, o_ref):
    acc = jnp.dot(x_ref[...], w_ref[...], preferred_element_type=jnp.float32)
    o_ref[...] = (acc + b_ref[...]).astype(o_ref.dtype)


def _choose_tile(M, max_tm=1024, core_count=2):
    """Pick (tm, Mp): tm multiple of 16 (bf16 sublanes); grid even when > 1 so the
    'parallel' row axis splits evenly across v7x's two TensorCores."""
    if M <= max_tm:
        tm = _round_up(max(M, 1), BF16_SUBLANE)
        return tm, tm
    g = _round_up(_cdiv(M, max_tm), core_count)
    tm = _round_up(_cdiv(M, g), BF16_SUBLANE)
    return tm, tm * g


def fused_matmul_bias(x, w, bias, *, apply_relu, out_dtype, max_tm=1024):
    """y = maybe_relu(x @ w + bias).

    x:    (M, K)  activations / im2col patches (f32 or bf16).
    w:    (Kp, Cp) bf16 weights, BN scale pre-folded, padded at init time
          (K -> multiple of 32, Cout -> multiple of 128).
    bias: (1, Cp)  f32 folded bias.
    Returns (M, Cp) out_dtype; caller slices off the padded channels lazily.
    """
    M, K = x.shape
    Kp, Cp = w.shape

    tm, Mp = _choose_tile(M, max_tm)

    # Row padding + small K padding of the activation matrix (layout plumbing).
    xp = jnp.pad(x, ((0, Mp - M), (0, Kp - K))).astype(jnp.bfloat16)

    kernel = _matmul_bias_relu_kernel if apply_relu else _matmul_bias_kernel

    out = pl.pallas_call(
        kernel,
        out_shape=jax.ShapeDtypeStruct((Mp, Cp), out_dtype),
        grid=(Mp // tm,),
        in_specs=[
            pl.BlockSpec((tm, Kp), lambda i: (i, 0)),   # x tile marches over rows
            pl.BlockSpec((Kp, Cp), lambda i: (0, 0)),   # weights VMEM-resident
            pl.BlockSpec((1, Cp), lambda i: (0, 0)),    # folded bias
        ],
        out_specs=pl.BlockSpec((tm, Cp), lambda i: (i, 0)),  # lane-dense output
        compiler_params=pltpu.CompilerParams(
            dimension_semantics=("parallel",),
            vmem_limit_bytes=32 * 1024 * 1024,
        ),
    )(xp, w, bias)
    return out[:M]


def _fused_matmul_ref(x, w, bias, *, apply_relu, out_dtype, max_tm=1024):
    """Pure-JAX reference with identical math (bf16 operands, f32 accumulate)."""
    del max_tm
    M, K = x.shape
    Kp, Cp = w.shape
    xp = jnp.pad(x, ((0, 0), (0, Kp - K))).astype(jnp.bfloat16)
    acc = jnp.dot(xp, w, preferred_element_type=jnp.float32)
    y = acc + bias
    if apply_relu:
        y = jnp.maximum(y, 0.0)
    return y.astype(out_dtype)


# ---------------------------- layout-only helpers ----------------------------
# TODO(synk): im2col patch extraction and the max-pool window reduction are pure
# data movement at these tiny spatial sizes, so they stay as plain-JAX
# reshape/slice glue (NHWC throughout, channels on the lane axis).

def _im2col_nhwc(x, k, padding):
    """(N, H, W, C) -> patches (N*Ho*Wo, k*k*C); patch-row order (kh, kw, c)."""
    N, H, W, C = x.shape
    if padding:
        x = jnp.pad(x, ((0, 0), (padding, padding), (padding, padding), (0, 0)))
    Ho = H + 2 * padding - k + 1
    Wo = W + 2 * padding - k + 1
    cols = [x[:, di:di + Ho, dj:dj + Wo, :] for di in range(k) for dj in range(k)]
    p = jnp.stack(cols, axis=3)               # (N, Ho, Wo, k*k, C)
    return p.reshape(N * Ho * Wo, k * k * C), Ho, Wo


def _maxpool_nhwc(x, k):
    """torch.nn.MaxPool2d(kernel_size=k): stride=k, floor mode, on NHWC."""
    N, H, W, C = x.shape
    Ho, Wo = H // k, W // k
    x = x[:, :Ho * k, :Wo * k, :].reshape(N, Ho, k, Wo, k, C)
    return x.max(axis=(2, 4))


def _unit(x, w, bias, *, k, padding, c_out, matmul_fn):
    """Unit: Conv2d(k, padding) -> BatchNorm2d(eval, folded into W/bias) -> ReLU.
    Input/output stay NHWC; intermediate activations are bf16."""
    N = x.shape[0]
    patches, Ho, Wo = _im2col_nhwc(x, k, padding)
    y = matmul_fn(patches, w, bias, apply_relu=True, out_dtype=jnp.bfloat16)
    return y[:, :c_out].reshape(N, Ho, Wo, c_out)


def convnet_forward(x_nchw, p, matmul_fn=fused_matmul_bias):
    """ConvNet: unit1->pool1(3)->unit2->pool2(2)->unit3->pool3(2)->flatten->fc.
    NCHW input (matching the torch module); one transpose to NHWC at the entry."""
    x = jnp.transpose(x_nchw, (0, 2, 3, 1))   # NCHW -> NHWC, once
    y = _unit(x, p["w1"], p["b1"], k=5, padding=3, c_out=16, matmul_fn=matmul_fn)
    y = _maxpool_nhwc(y, 3)
    y = _unit(y, p["w2"], p["b2"], k=2, padding=0, c_out=32, matmul_fn=matmul_fn)
    y = _maxpool_nhwc(y, 2)
    y = _unit(y, p["w3"], p["b3"], k=2, padding=0, c_out=16, matmul_fn=matmul_fn)
    y = _maxpool_nhwc(y, 2)
    # Flatten in (H, W, C) order; with randomly-initialized FC weights this is an
    # equivalent permutation of torch's (C, H, W) .view ordering.
    flat = y.reshape(x_nchw.shape[0], -1)      # (N, 64)
    out = matmul_fn(flat, p["wf"], p["bf"], apply_relu=False, out_dtype=jnp.float32)
    return out[:, :p["num_classes"]]


# --------------------------------- parameters --------------------------------

def _pad_weight(w):
    """Pad (K, Cout): K -> multiple of 32 only, Cout -> multiple of 128 (lane
    dense).  Stored as the bf16 MXU operand."""
    K, C = w.shape
    wp = jnp.pad(w, ((0, _round_up(K, 32) - K), (0, _round_up(C, LANE) - C)))
    return wp.astype(jnp.bfloat16)


def _pad_row(v):
    C = v.shape[0]
    return jnp.pad(v, (0, _round_up(C, LANE) - C)).reshape(1, -1).astype(jnp.float32)


def _unit_params(key, c_in, c_out, k, eps=1e-5):
    """Conv2d + BatchNorm2d(eval) parameters folded into (W*scale, bias)."""
    kw, kb, kg, kbe, km, kv = jax.random.split(key, 6)
    fan_in = c_in * k * k
    s = 1.0 / (fan_in ** 0.5)
    # Conv weight stored as (k*k*C_in, C_out) with row order (kh, kw, c_in) so the
    # NHWC im2col patches hit the same ordering (channels kept on the lane axis).
    w = jax.random.uniform(kw, (fan_in, c_out), jnp.float32, -s, s)
    conv_b = jax.random.uniform(kb, (c_out,), jnp.float32, -s, s)
    gamma = jax.random.uniform(kg, (c_out,), jnp.float32, 0.5, 1.5)
    beta = 0.1 * jax.random.normal(kbe, (c_out,), jnp.float32)
    r_mean = 0.1 * jax.random.normal(km, (c_out,), jnp.float32)
    r_var = jax.random.uniform(kv, (c_out,), jnp.float32, 0.5, 1.5)
    # TODO(synk): training-mode BatchNorm (batch statistics + running-stat update)
    # not implemented; eval-mode BN (and the conv bias) is folded into the weights
    # (per-output-channel scale, applied in f32 before the bf16 cast) and a bias.
    scale = gamma / jnp.sqrt(r_var + eps)
    bias = beta + (conv_b - r_mean) * scale
    w_folded = w * scale[None, :]
    return _pad_weight(w_folded), _pad_row(bias)


def init_convnet_params(key, in_channels=1, num_classes=36):
    k1, k2, k3, k4 = jax.random.split(key, 4)
    p = {"num_classes": num_classes}
    p["w1"], p["b1"] = _unit_params(k1, in_channels, 16, 5)
    p["w2"], p["b2"] = _unit_params(k2, 16, 32, 2)
    p["w3"], p["b3"] = _unit_params(k3, 32, 16, 2)
    # fc: Linear(64 -> num_classes); reuses the fused kernel without ReLU.
    kw, kb = jax.random.split(k4)
    s = 1.0 / (64 ** 0.5)
    wf = jax.random.uniform(kw, (64, num_classes), jnp.float32, -s, s)
    bf = jax.random.uniform(kb, (num_classes,), jnp.float32, -s, s)
    p["wf"] = _pad_weight(wf)
    p["bf"] = _pad_row(bf)
    return p


if __name__ == "__main__":
    # NIST36-style 32x32 grayscale input -> (34->11->10->5->4->2) spatial chain
    # -> 16*2*2 = 64 flattened features -> fc(64, 36), matching the PyTorch model.
    N, C, H, W = 2, 1, 32, 32
    num_classes = 36

    key = jax.random.PRNGKey(0)
    kx, kp = jax.random.split(key)
    x = jax.random.normal(kx, (N, C, H, W), jnp.float32)
    params = init_convnet_params(kp, in_channels=C, num_classes=num_classes)

    y = convnet_forward(x, params, matmul_fn=fused_matmul_bias)
    jax.block_until_ready(y)

    y_ref = convnet_forward(x, params, matmul_fn=_fused_matmul_ref)
    assert y.shape == (N, num_classes)
    max_err = float(jnp.max(jnp.abs(y - y_ref)))
    # Tolerance accounts for bf16-rounded intermediate activations (unit outputs
    # are stored as bf16 on both the Pallas and reference paths).
    assert jnp.allclose(y, y_ref, atol=1e-2, rtol=1e-2), f"max abs err {max_err}"

    print("KERNEL_OK")
</pallas_src>

<mosaic_0001>
module attributes {stable_mosaic.version = 11 : i64} {
  func.func @_matmul_bias_relu_kernel(%arg0: i32, %arg1: memref<592x32xbf16, #tpu.memory_space<vmem>>, %arg2: memref<32x128xbf16, #tpu.memory_space<vmem>>, %arg3: memref<1x128xf32, #tpu.memory_space<vmem>>, %arg4: memref<592x128xbf16, #tpu.memory_space<vmem>>) attributes {dimension_semantics = [#tpu.dimension_semantics<parallel>], iteration_bounds = array<i64: 4>, scalar_prefetch = 0 : i64, scratch_operands = 0 : i64, tpu.core_type = #tpu.core_type<tc>, window_params = [{transform_indices = @transform_0, window_bounds = array<i64: 592, 32>}, {pipeline_mode = #tpu.pipeline_mode<synchronous>, transform_indices = @transform_1, window_bounds = array<i64: 32, 128>}, {pipeline_mode = #tpu.pipeline_mode<synchronous>, transform_indices = @transform_2, window_bounds = array<i64: 1, 128>}, {transform_indices = @transform_3, window_bounds = array<i64: 592, 128>}]} {
    %c0 = arith.constant 0 : index
    %c0_0 = arith.constant 0 : index
    %0 = vector.load %arg1[%c0, %c0_0] : memref<592x32xbf16, #tpu.memory_space<vmem>>, vector<592x32xbf16>
    %c0_1 = arith.constant 0 : index
    %c0_2 = arith.constant 0 : index
    %1 = vector.load %arg2[%c0_1, %c0_2] : memref<32x128xbf16, #tpu.memory_space<vmem>>, vector<32x128xbf16>
    %cst = arith.constant dense<0.000000e+00> : vector<592x128xf32>
    %2 = tpu.matmul %0, %1, %cst {dimension_numbers = #tpu.dot_dimension_numbers<[1], [0], [0], [1], [0, 0, 1, 1], [], []>} : vector<592x32xbf16>, vector<32x128xbf16>, vector<592x128xf32> -> vector<592x128xf32>
    %c0_3 = arith.constant 0 : index
    %c0_4 = arith.constant 0 : index
    %3 = vector.load %arg3[%c0_3, %c0_4] : memref<1x128xf32, #tpu.memory_space<vmem>>, vector<1x128xf32>
    %4 = vector.broadcast %3 : vector<1x128xf32> to vector<592x128xf32>
    %5 = arith.addf %2, %4 : vector<592x128xf32>
    %cst_5 = arith.constant 0.000000e+00 : f32
    %6 = vector.broadcast %cst_5 : f32 to vector<592x128xf32>
    %7 = arith.maximumf %5, %6 : vector<592x128xf32>
    %8 = arith.truncf %7 : vector<592x128xf32> to vector<592x128xbf16>
    %c0_6 = arith.constant 0 : index
    %c0_7 = arith.constant 0 : index
    %9 = vector.load %arg4[%c0_6, %c0_7] : memref<592x128xbf16, #tpu.memory_space<vmem>>, vector<592x128xbf16>
    tpu.vector_store %arg4[%c0_6, %c0_7], %8 {strides = array<i32>} : memref<592x128xbf16, #tpu.memory_space<vmem>>, vector<592x128xbf16>,
    return
  }
  func.func @transform_0(%arg0: i32) -> (i32, i32) {
    %c0_i32 = arith.constant 0 : i32
    %c0_i32_0 = arith.constant 0 : i32
    return %arg0, %c0_i32 : i32, i32
  }
  func.func @transform_1(%arg0: i32) -> (i32, i32) {
    %c0_i32 = arith.constant 0 : i32
    %c0_i32_0 = arith.constant 0 : i32
    %c0_i32_1 = arith.constant 0 : i32
    return %c0_i32, %c0_i32_0 : i32, i32
  }
  func.func @transform_2(%arg0: i32) -> (i32, i32) {
    %c0_i32 = arith.constant 0 : i32
    %c0_i32_0 = arith.constant 0 : i32
    %c0_i32_1 = arith.constant 0 : i32
    return %c0_i32, %c0_i32_0 : i32, i32
  }
  func.func @transform_3(%arg0: i32) -> (i32, i32) {
    %c0_i32 = arith.constant 0 : i32
    %c0_i32_0 = arith.constant 0 : i32
    return %arg0, %c0_i32 : i32, i32
  }
}

</mosaic_0001>

<bundles_post_ra>
// kernel: tpu_custom_call.1
= control target key start
LH: loop header
LB: loop body
LE: loop exit
PB: predicated region body
PF: predicated region fallthrough
CT: control target
= control target key end

     0   :  { %8 = vsyncpa [#allocation3], 0  ;;  %s2623_s0 = inlined_call_operand.vmem [shape: bf16[2368,32], index: 0, kind: input, shape index: {}]   ;;  %s2624_s1 = inlined_call_operand.vmem [shape: bf16[32,128], index: 1, kind: input, shape index: {}]   ;;  %s2625_s2 = inlined_call_operand.vmem [shape: f32[1,128], index: 2, kind: input, shape index: {}]   ;;  %s2626_s3 = inlined_call_operand.hbm [shape: bf16[2368,128], index: 3, kind: output, shape index: {}]  }
   0x1   :  { %10 = vsyncpa [#allocation3 + $0x1], 0  ;;  %s2238_s12 = smov 0   ;;  %s2240_s13 = smov 0  }
   0x2   :  { %s2242_s14 = smov 0   ;;  %s2244_s15 = smov 0  }
   0x3 LB: > { %s2259_s16 = sadd.s32 4294967295, %s2211_s15   ;;  %s1416_s17 = sadd.s32 4294967294, %s2211_s15   ;;  %s2211_s15 = sphi %s2244_s15, %s2632_s15   ;;  %s2207_s14 = sphi %s2242_s14, %s2631_s14   ;;  %s2203_s13 = sphi %s2240_s13, %s2630_s13   ;;  %s2199_s12 = sphi %s2238_s12, %s2629_s12  }
   0x4   : > { %s2263_s18 = sadd.s32 1, %s2211_s15   ;;  %s91_s19 = sadd.s32 1, %s2207_s14 }
   0x5   : > { %s88_s20 = ssub.s32 %s2211_s15, %s2263_s18  ;;  %p101_p0 = scmp.ne.s32.totalorder %s2207_s14, %s2203_s13 }
   0x6   : > { %p89_p1 = scmp.eq.s32.totalorder %s88_s20, 0  ;;  %p102_p2 = scmp.eq.s32.totalorder %s2259_s16, 3 }
   0x7   : > { %p107_p3 = scmp.ne.s32.totalorder %s2203_s13, %s2199_s12  ;;  %p108_p4 = scmp.eq.s32.totalorder %s1416_s17, 3 }
   0x8   : > { %s2274_s21 = scalar_select %p89_p1, %s2207_s14, %s91_s19  }
   0x9   : > { %p2276_p5 = por %p102_p2, %p101_p0  ;;  %p2280_p6 = por %p108_p4, %p107_p3 }
   0xa   : > { %p1419_p7 = scmp.ge.s32.totalorder %s2211_s15, 1  ;;  %p141_p8 = scmp.lt.s32.totalorder %s2211_s15, 5 }
   0xc   : > { %p142_p9 = pnand %p1419_p7, %p141_p8 }
   0xd   : > { %v2110_v0 = vld [vmem:[%s2624_s1] sm:$0xff] (!%p142_p9)   ;;  %v2213_v1 = vmov (!%p142_p9), 0.0   ;;  %v2111_v2 = vld [vmem:[%s2624_s1 + $0x8] sm:$0xff] (!%p142_p9)   ;;  %s165_s28 = smul.u32 (!%p142_p9), 74, %s2259_s16  ;;  %vm2214_vm0 = vmmov (!%p142_p9), 0   ;;  %vm455_vm1 = vcmask (!%p142_p9), 261120  }
   0xe   : > { %145 = sbr.rel (%p142_p9) target bundleno = 404 (0x194), region = 32  ;;  %1910 = vmatprep.subr.bf16.mxu0 (!%p142_p9), %v2213_v1  ;;  %2062 = vmatprep.subr.bf16.mxu1 (!%p142_p9), %v2213_v1  ;;  %v2453_v40 = vld [vmem:[%s2625_s2] ss:$0 sm:$0xff] (!%p142_p9)  ;;  %s162_s8 = sand.u32 (!%p142_p9), 1, %s2203_s13  }
   0xf   : > { %1911 = vmatpush3.bf16.msra.mxu0 (!%p142_p9), %v2110_v0  ;;  %2064 = vmatpush3.bf16.msra.mxu1 (!%p142_p9), %v2110_v0  ;;  %p166_p10 = scmp.lt.s32.totalorder (!%p142_p9), %s165_s28, 295  ;;  %s2066_s9 = smul.u32 (!%p142_p9), 296, %s162_s8 }
  0x10   : > { %1912 = vmatprep.subr.bf16.mxu0 (!%p142_p9), %v2213_v1  ;;  %1914 = vmatprep.mubr.msk.bf16.mxu0 (!%p142_p9), %vm2214_vm0, %v2213_v1  ;;  %s1649_s11 = smul.u32 (!%p142_p9), 4736, %s2259_s16  ;;  %s2582_s16 = scalar_lea.sflag (!%p142_p9), [#allocation3], %s162_s8 }
  0x11   : > { %2063 = vmatprep.subr.bf16.mxu1 (!%p142_p9), %v2213_v1  ;;  %1990 = vmatprep.mubr.msk.bf16.mxu1 (!%p142_p9), %vm2214_vm0, %v2213_v1  ;;  %s2462_s10 = scalar_lea.vmem (!%p142_p9), [#allocation2], %s2066_s9  ;;  %s2215_s26 = smov (!%p142_p9), [#allocation2]  }
  0x12   : > { %s1354_s17 = sshll.u32 (!%p142_p9), %s2462_s10, 4  ;;  %s2575_s24 = scalar_lea.hbm (!%p142_p9), %s2626_s3, %s1649_s11  ;;  %s2577_s17 = int_to_ptr.vmem [resolvable:$true] %s1354_s17 }
  0x13   : > { %1913 = vmatpush3.bf16.msra.mxu0 (!%p142_p9), %v2111_v2  ;;  %2065 = vmatpush3.bf16.msra.mxu1 (!%p142_p9), %v2111_v2  ;;  %s2149_s25 = scalar_lea.vmem (!%p142_p9), %s2577_s17, 4736  ;;  %s2153_s27 = sshll.u32 (!%p142_p9), %s2215_s26, 4  ;;  %s2154_s27 = int_to_ptr.vmem [resolvable:$false] %s2153_s27 }
  0x14   : > { %p2150_p11 = scmp.ne.s32.totalorder (!%p142_p9), %s2577_s17, %s2149_s25  ;;  %p2156_p0 = scmp.lt.s32.totalorder (!%p142_p9), %s2577_s17, %s2154_s27 }
  0x15   : > { %s2634_s28 = smov (!%p166_p10, %s165_s28), 295 }
  0x16   : > { %s1420_s29 = sshll.u32 %s2634_s28, 2  ;;  %p2151_p12 = pnand %p2150_p11, %p2276_p5 }
  0x17   : > { %s2304_s5 = scalar_lea.vmem %s2623_s0, %s1420_s29  ;;  %s2155_s28 = scalar_lea.vmem %s2154_s27, 9472 }
  0x18   : > { %v2112_v3 = vld [vmem:[%s2304_s5] sm:$0xff]   ;;  %v2113_v4 = vld [vmem:[%s2304_s5 + $0x98] sm:$0xff]   ;;  %v2114_v5 = vld [vmem:[%s2304_s5 + $0x8] sm:$0xff]   ;;  %p2152_p13 = pneg %p2151_p12  ;;  %p2157_p1 = scmp.lt.s32.totalorder %s2155_s28, %s2149_s25 }
  0x19   : > { %1915 = vmatmul.mubr.msk.bf16.vlgmr.msra.gmra.mrb[0].mxu0 %vm455_vm1, %v2112_v3  ;;  %1991 = vmatmul.mubr.msk.bf16.vlgmr.msra.gmra.mrb[0].mxu1 %vm455_vm1, %v2113_v4  ;;  %v2115_v6 = vld [vmem:[%s2304_s5 + $0xa0] sm:$0xff]   ;;  %v2116_v7 = vld [vmem:[%s2304_s5 + $0x10] sm:$0xff]   ;;  %v2117_v8 = vld [vmem:[%s2304_s5 + $0xa8] sm:$0xff]  }
  0x1a   : > { %1918 = vmatprep.mubr.msk.bf16.mxu0 %vm2214_vm0, %v2213_v1  ;;  %1994 = vmatprep.mubr.msk.bf16.mxu1 %vm2214_vm0, %v2213_v1  ;;  %v2118_v9 = vld [vmem:[%s2304_s5 + $0x18] sm:$0xff]   ;;  %v2119_v10 = vld [vmem:[%s2304_s5 + $0xb0] sm:$0xff]   ;;  %v2120_v11 = vld [vmem:[%s2304_s5 + $0x20] sm:$0xff]   ;;  %p2158_p2 = por %p2157_p1, %p2156_p0 }
  0x1b   : > { %v2121_v12 = vld [vmem:[%s2304_s5 + $0xb8] sm:$0xff]   ;;  %v2122_v13 = vld [vmem:[%s2304_s5 + $0x28] sm:$0xff]   ;;  %v2123_v14 = vld [vmem:[%s2304_s5 + $0xc0] sm:$0xff]  }
  0x1c   : > { %v2124_v15 = vld [vmem:[%s2304_s5 + $0x30] sm:$0xff]   ;;  %v2125_v16 = vld [vmem:[%s2304_s5 + $0xc8] sm:$0xff]   ;;  %v2126_v17 = vld [vmem:[%s2304_s5 + $0x38] sm:$0xff]   ;;  %p2159_p3 = pnand %p2158_p2, %p2152_p13 }
  0x1d   : > { %v2127_v18 = vld [vmem:[%s2304_s5 + $0xd0] sm:$0xff]   ;;  %v2128_v19 = vld [vmem:[%s2304_s5 + $0x40] sm:$0xff]   ;;  %v2129_v20 = vld [vmem:[%s2304_s5 + $0xd8] sm:$0xff]  }
  0x1e   : > { %v2130_v21 = vld [vmem:[%s2304_s5 + $0x48] sm:$0xff]   ;;  %v2131_v22 = vld [vmem:[%s2304_s5 + $0xe0] sm:$0xff]   ;;  %v2132_v23 = vld [vmem:[%s2304_s5 + $0x50] sm:$0xff]  }
  0x1f   : > { %v2133_v24 = vld [vmem:[%s2304_s5 + $0xe8] sm:$0xff]   ;;  %v2134_v25 = vld [vmem:[%s2304_s5 + $0x58] sm:$0xff]   ;;  %v2135_v26 = vld [vmem:[%s2304_s5 + $0xf0] sm:$0xff]  }
  0x20   : > { %v2136_v27 = vld [vmem:[%s2304_s5 + $0x60] sm:$0xff]   ;;  %v2137_v28 = vld [vmem:[%s2304_s5 + $0xf8] sm:$0xff]   ;;  %v2138_v29 = vld [vmem:[%s2304_s5 + $0x68] sm:$0xff]  }
  0x21   : > { %1919 = vmatmul.mubr.msk.bf16.gmra.mrb[4].mxu0 %vm455_vm1, %v2114_v5  ;;  %1995 = vmatmul.mubr.msk.bf16.gmra.mrb[4].mxu1 %vm455_vm1, %v2115_v6  ;;  %v2139_v30 = vld [vmem:[%s2304_s5 + $0x100] sm:$0xff]   ;;  %v2140_v31 = vld [vmem:[%s2304_s5 + $0x70] sm:$0xff]   ;;  %v2141_v32 = vld [vmem:[%s2304_s5 + $0x108] sm:$0xff]  }
  0x22   : > { %1922 = vmatprep.mubr.msk.bf16.mxu0 %vm2214_vm0, %v2213_v1  ;;  %1998 = vmatprep.mubr.msk.bf16.mxu1 %vm2214_vm0, %v2213_v1  ;;  %v2142_v33 = vld [vmem:[%s2304_s5 + $0x78] sm:$0xff]   ;;  %v2143_v34 = vld [vmem:[%s2304_s5 + $0x110] sm:$0xff]   ;;  %v2144_v35 = vld [vmem:[%s2304_s5 + $0x80] sm:$0xff]  }
  0x23   : > { %v2145_v36 = vld [vmem:[%s2304_s5 + $0x118] sm:$0xff]   ;;  %v2146_v37 = vld [vmem:[%s2304_s5 + $0x88] sm:$0xff]   ;;  %v2147_v38 = vld [vmem:[%s2304_s5 + $0x120] sm:$0xff]  }
  0x24   : > { %v2148_v39 = vld [vmem:[%s2304_s5 + $0x90] sm:$0xff]  }
  0x29   : > { %1923 = vmatmul.mubr.msk.bf16.gmra.mrb[8].mxu0 %vm455_vm1, %v2116_v7  ;;  %1999 = vmatmul.mubr.msk.bf16.gmra.mrb[8].mxu1 %vm455_vm1, %v2117_v8 }
  0x2a   : > { %1926 = vmatprep.mubr.msk.bf16.mxu0 %vm2214_vm0, %v2213_v1  ;;  %2002 = vmatprep.mubr.msk.bf16.mxu1 %vm2214_vm0, %v2213_v1 }
  0x31   : > { %1927 = vmatmul.mubr.msk.bf16.gmra.mrb[12].mxu0 %vm455_vm1, %v2118_v9  ;;  %2003 = vmatmul.mubr.msk.bf16.gmra.mrb[12].mxu1 %vm455_vm1, %v2119_v10 }
  0x32   : > { %1930 = vmatprep.mubr.msk.bf16.mxu0 %vm2214_vm0, %v2213_v1  ;;  %2006 = vmatprep.mubr.msk.bf16.mxu1 %vm2214_vm0, %v2213_v1 }
  0x39   : > { %1931 = vmatmul.mubr.msk.bf16.gmra.mrb[16].mxu0 %vm455_vm1, %v2120_v11  ;;  %2007 = vmatmul.mubr.msk.bf16.gmra.mrb[16].mxu1 %vm455_vm1, %v2121_v12 }
  0x3a   : > { %1934 = vmatprep.mubr.msk.bf16.mxu0 %vm2214_vm0, %v2213_v1  ;;  %2010 = vmatprep.mubr.msk.bf16.mxu1 %vm2214_vm0, %v2213_v1 }
  0x41   : > { %1935 = vmatmul.mubr.msk.bf16.gmra.mrb[20].mxu0 %vm455_vm1, %v2122_v13  ;;  %2011 = vmatmul.mubr.msk.bf16.gmra.mrb[20].mxu1 %vm455_vm1, %v2123_v14 }
  0x42   : > { %1938 = vmatprep.mubr.msk.bf16.mxu0 %vm2214_vm0, %v2213_v1  ;;  %2014 = vmatprep.mubr.msk.bf16.mxu1 %vm2214_vm0, %v2213_v1 }
  0x49   : > { %1939 = vmatmul.mubr.msk.bf16.gmra.mrb[24].mxu0 %vm455_vm1, %v2124_v15  ;;  %2015 = vmatmul.mubr.msk.bf16.gmra.mrb[24].mxu1 %vm455_vm1, %v2125_v16 }
  0x4a   : > { %1942 = vmatprep.mubr.msk.bf16.mxu0 %vm2214_vm0, %v2213_v1  ;;  %2018 = vmatprep.mubr.msk.bf16.mxu1 %vm2214_vm0, %v2213_v1 }
  0x51   : > { %1943 = vmatmul.mubr.msk.bf16.gmra.mrb[28].mxu0 %vm455_vm1, %v2126_v17  ;;  %2019 = vmatmul.mubr.msk.bf16.gmra.mrb[28].mxu1 %vm455_vm1, %v2127_v18 }
  0x52   : > { %1946 = vmatprep.mubr.msk.bf16.mxu0 %vm2214_vm0, %v2213_v1  ;;  %2022 = vmatprep.mubr.msk.bf16.mxu1 %vm2214_vm0, %v2213_v1 }
  0x59   : > { %1947 = vmatmul.mubr.msk.bf16.gmra.mrb[32].mxu0 %vm455_vm1, %v2128_v19  ;;  %2023 = vmatmul.mubr.msk.bf16.gmra.mrb[32].mxu1 %vm455_vm1, %v2129_v20 }
  0x5a   : > { %1950 = vmatprep.mubr.msk.bf16.mxu0 %vm2214_vm0, %v2213_v1  ;;  %2026 = vmatprep.mubr.msk.bf16.mxu1 %vm2214_vm0, %v2213_v1 }
  0x61   : > { %1951 = vmatmul.mubr.msk.bf16.gmra.mrb[36].mxu0 %vm455_vm1, %v2130_v21  ;;  %2027 = vmatmul.mubr.msk.bf16.gmra.mrb[36].mxu1 %vm455_vm1, %v2131_v22 }
  0x62   : > { %1954 = vmatprep.mubr.msk.bf16.mxu0 %vm2214_vm0, %v2213_v1  ;;  %2030 = vmatprep.mubr.msk.bf16.mxu1 %vm2214_vm0, %v2213_v1 }
  0x69   : > { %1955 = vmatmul.mubr.msk.bf16.gmra.mrb[40].mxu0 %vm455_vm1, %v2132_v23  ;;  %2031 = vmatmul.mubr.msk.bf16.gmra.mrb[40].mxu1 %vm455_vm1, %v2133_v24 }
  0x6a   : > { %1958 = vmatprep.mubr.msk.bf16.mxu0 %vm2214_vm0, %v2213_v1  ;;  %2034 = vmatprep.mubr.msk.bf16.mxu1 %vm2214_vm0, %v2213_v1 }
  0x71   : > { %1959 = vmatmul.mubr.msk.bf16.gmra.mrb[44].mxu0 %vm455_vm1, %v2134_v25  ;;  %2035 = vmatmul.mubr.msk.bf16.gmra.mrb[44].mxu1 %vm455_vm1, %v2135_v26 }
  0x72   : > { %1962 = vmatprep.mubr.msk.bf16.mxu0 %vm2214_vm0, %v2213_v1  ;;  %2038 = vmatprep.mubr.msk.bf16.mxu1 %vm2214_vm0, %v2213_v1 }
  0x79   : > { %1963 = vmatmul.mubr.msk.bf16.gmra.mrb[48].mxu0 %vm455_vm1, %v2136_v27  ;;  %2039 = vmatmul.mubr.msk.bf16.gmra.mrb[48].mxu1 %vm455_vm1, %v2137_v28 }
  0x7a   : > { %1966 = vmatprep.mubr.msk.bf16.mxu0 %vm2214_vm0, %v2213_v1  ;;  %2042 = vmatprep.mubr.msk.bf16.mxu1 %vm2214_vm0, %v2213_v1 }
  0x81   : > { %1967 = vmatmul.mubr.msk.bf16.gmra.mrb[52].mxu0 %vm455_vm1, %v2138_v29  ;;  %2043 = vmatmul.mubr.msk.bf16.gmra.mrb[52].mxu1 %vm455_vm1, %v2139_v30 }
  0x82   : > { %1970 = vmatprep.mubr.msk.bf16.mxu0 %vm2214_vm0, %v2213_v1  ;;  %2046 = vmatprep.mubr.msk.bf16.mxu1 %vm2214_vm0, %v2213_v1 }
  0x89   : > { %1971 = vmatmul.mubr.msk.bf16.gmra.mrb[56].mxu0 %vm455_vm1, %v2140_v31  ;;  %2047 = vmatmul.mubr.msk.bf16.gmra.mrb[56].mxu1 %vm455_vm1, %v2141_v32 }
  0x8a   : > { %1974 = vmatprep.mubr.msk.bf16.mxu0 %vm2214_vm0, %v2213_v1  ;;  %2050 = vmatprep.mubr.msk.bf16.mxu1 %vm2214_vm0, %v2213_v1 }
  0x91   : > { %1975 = vmatmul.mubr.msk.bf16.gmra.mrb[60].mxu0 %vm455_vm1, %v2142_v33  ;;  %2051 = vmatmul.mubr.msk.bf16.gmra.mrb[60].mxu1 %vm455_vm1, %v2143_v34 }
  0x92   : > { %1978 = vmatprep.mubr.msk.bf16.mxu0 %vm2214_vm0, %v2213_v1  ;;  %2054 = vmatprep.mubr.msk.bf16.mxu1 %vm2214_vm0, %v2213_v1 }
  0x99   : > { %1979 = vmatmul.mubr.msk.bf16.gmra.mrb[64].mxu0 %vm455_vm1, %v2144_v35  ;;  %2055 = vmatmul.mubr.msk.bf16.gmra.mrb[64].mxu1 %vm455_vm1, %v2145_v36 }
  0x9a   : > { %1982 = vmatprep.mubr.msk.bf16.mxu0 %vm2214_vm0, %v2213_v1  ;;  %2058 = vmatprep.mubr.msk.bf16.mxu1 %vm2214_vm0, %v2213_v1 }
  0xa1   : > { %1983 = vmatmul.mubr.msk.bf16.gmra.mrb[68].mxu0 %vm455_vm1, %v2146_v37  ;;  %2059 = vmatmul.mubr.msk.bf16.gmra.mrb[68].mxu1 %vm455_vm1, %v2147_v38 }
  0xa2   : > { %1986 = vmatprep.mubr.msk.bf16.mxu0 %vm2214_vm0, %v2213_v1 }
  0xa9   : > { %1987 = vmatmul.mubr.msk.bf16.gmra.mrb[72].mxu0 %vm455_vm1, %v2148_v39 }
  0xec   : > { %v601_v41 = vpop.f32.mrb[0].mxu0  ;;  %v753_v44 = vpop.f32.mrb[0].mxu1 }
  0xed   : > { %v602_v42 = vadd.f32 %v2453_v40, %v601_v41  ;;  %v1916_v43 = vpop.f32.mrb[1].mxu0  ;;  %v754_v46 = vadd.f32 %v2453_v40, %v753_v44  ;;  %v1992_v47 = vpop.f32.mrb[1].mxu1 }
  0xee   : > { %v604_v45 = vpop.f32.mrb[2].mxu0  ;;  %v756_v50 = vpop.f32.mrb[2].mxu1 }
  0xef   : > { %v605_v48 = vadd.f32 %v2453_v40, %v604_v45  ;;  %v1917_v49 = vpop.f32.mrb[3].mxu0  ;;  %v934_v51 = vmax.f32 %v754_v46, 0.0  ;;  %v757_v52 = vadd.f32 %v2453_v40, %v756_v50  ;;  %v1993_v53 = vpop.f32.mrb[3].mxu1  ;;  %v896_v54 = vmax.f32 %v602_v42, 0.0 }
  0xf1   : > { %v897_v55 = vmax.f32 %v605_v48, 0.0  ;;  %v935_v56 = vmax.f32 %v757_v52, 0.0 }
  0xf3   : > { %v1653_v57 = vpack.c.bf16 %v897_v55, %v896_v54  ;;  %v1748_v58 = vpack.c.bf16 %v935_v56, %v934_v51 }
  0xf4   : > { %v609_v59 = vpop.f32.mrb[4].mxu0  ;;  %v761_v62 = vpop.f32.mrb[4].mxu1 }
  0xf5   : > { %1654 = vst [vmem:[%s2462_s10] sm:$0xff] %v1653_v57   ;;  %v610_v60 = vadd.f32 %v2453_v40, %v609_v59  ;;  %v1920_v61 = vpop.f32.mrb[5].mxu0  ;;  %1853 = vst [vmem:[%s2462_s10 + $0x98] sm:$0xff] %v1748_v58   ;;  %v762_v0 = vadd.f32 %v2453_v40, %v761_v62  ;;  %v1996_v1 = vpop.f32.mrb[5].mxu1 }
  0xf6   : > { %v612_v63 = vpop.f32.mrb[6].mxu0  ;;  %v764_v4 = vpop.f32.mrb[6].mxu1 }
  0xf7   : > { %v613_v2 = vadd.f32 %v2453_v40, %v612_v63  ;;  %v1921_v3 = vpop.f32.mrb[7].mxu0  ;;  %v936_v5 = vmax.f32 %v762_v0, 0.0  ;;  %v765_v6 = vadd.f32 %v2453_v40, %v764_v4  ;;  %v1997_v7 = vpop.f32.mrb[7].mxu1  ;;  %v898_v8 = vmax.f32 %v610_v60, 0.0 }
  0xf9   : > { %v899_v9 = vmax.f32 %v613_v2, 0.0  ;;  %v937_v10 = vmax.f32 %v765_v6, 0.0 }
  0xfb   : > { %v1658_v11 = vpack.c.bf16 %v899_v9, %v898_v8  ;;  %v1753_v12 = vpack.c.bf16 %v937_v10, %v936_v5 }
  0xfc   : > { %v617_v13 = vpop.f32.mrb[8].mxu0  ;;  %v769_v16 = vpop.f32.mrb[8].mxu1 }
  0xfd   : > { %1835 = vst [vmem:[%s2462_s10 + $0x8] sm:$0xff] %v1658_v11   ;;  %v618_v14 = vadd.f32 %v2453_v40, %v617_v13  ;;  %v1924_v15 = vpop.f32.mrb[9].mxu0  ;;  %1854 = vst [vmem:[%s2462_s10 + $0xa0] sm:$0xff] %v1753_v12   ;;  %v770_v18 = vadd.f32 %v2453_v40, %v769_v16  ;;  %v2000_v19 = vpop.f32.mrb[9].mxu1 }
  0xfe   : > { %v620_v17 = vpop.f32.mrb[10].mxu0  ;;  %v772_v22 = vpop.f32.mrb[10].mxu1 }
  0xff   : > { %v621_v20 = vadd.f32 %v2453_v40, %v620_v17  ;;  %v1925_v21 = vpop.f32.mrb[11].mxu0  ;;  %v938_v23 = vmax.f32 %v770_v18, 0.0  ;;  %v773_v24 = vadd.f32 %v2453_v40, %v772_v22  ;;  %v2001_v25 = vpop.f32.mrb[11].mxu1  ;;  %v900_v26 = vmax.f32 %v618_v14, 0.0 }
 0x101   : > { %v901_v27 = vmax.f32 %v621_v20, 0.0  ;;  %v939_v28 = vmax.f32 %v773_v24, 0.0 }
 0x103   : > { %v1663_v29 = vpack.c.bf16 %v901_v27, %v900_v26  ;;  %v1758_v30 = vpack.c.bf16 %v939_v28, %v938_v23 }
 0x104   : > { %v625_v31 = vpop.f32.mrb[12].mxu0  ;;  %v777_v34 = vpop.f32.mrb[12].mxu1 }
 0x105   : > { %1836 = vst [vmem:[%s2462_s10 + $0x10] sm:$0xff] %v1663_v29   ;;  %v626_v32 = vadd.f32 %v2453_v40, %v625_v31  ;;  %v1928_v33 = vpop.f32.mrb[13].mxu0  ;;  %1855 = vst [vmem:[%s2462_s10 + $0xa8] sm:$0xff] %v1758_v30   ;;  %v778_v36 = vadd.f32 %v2453_v40, %v777_v34  ;;  %v2004_v37 = vpop.f32.mrb[13].mxu1 }
 0x106   : > { %v628_v35 = vpop.f32.mrb[14].mxu0  ;;  %v780_v41 = vpop.f32.mrb[14].mxu1 }
 0x107   : > { %v629_v38 = vadd.f32 %v2453_v40, %v628_v35  ;;  %v1929_v39 = vpop.f32.mrb[15].mxu0  ;;  %v940_v42 = vmax.f32 %v778_v36, 0.0  ;;  %v781_v43 = vadd.f32 %v2453_v40, %v780_v41  ;;  %v2005_v44 = vpop.f32.mrb[15].mxu1  ;;  %v902_v45 = vmax.f32 %v626_v32, 0.0 }
 0x109   : > { %v903_v46 = vmax.f32 %v629_v38, 0.0  ;;  %v941_v47 = vmax.f32 %v781_v43, 0.0 }
 0x10b   : > { %v1668_v48 = vpack.c.bf16 %v903_v46, %v902_v45  ;;  %v1763_v49 = vpack.c.bf16 %v941_v47, %v940_v42 }
 0x10c   : > { %v633_v50 = vpop.f32.mrb[16].mxu0  ;;  %v785_v53 = vpop.f32.mrb[16].mxu1 }
 0x10d   : > { %1837 = vst [vmem:[%s2462_s10 + $0x18] sm:$0xff] %v1668_v48   ;;  %v634_v51 = vadd.f32 %v2453_v40, %v633_v50  ;;  %v1932_v52 = vpop.f32.mrb[17].mxu0  ;;  %1856 = vst [vmem:[%s2462_s10 + $0xb0] sm:$0xff] %v1763_v49   ;;  %v786_v55 = vadd.f32 %v2453_v40, %v785_v53  ;;  %v2008_v56 = vpop.f32.mrb[17].mxu1 }
 0x10e   : > { %v636_v54 = vpop.f32.mrb[18].mxu0  ;;  %v788_v59 = vpop.f32.mrb[18].mxu1 }
 0x10f   : > { %v637_v57 = vadd.f32 %v2453_v40, %v636_v54  ;;  %v1933_v58 = vpop.f32.mrb[19].mxu0  ;;  %v942_v60 = vmax.f32 %v786_v55, 0.0  ;;  %v789_v61 = vadd.f32 %v2453_v40, %v788_v59  ;;  %v2009_v62 = vpop.f32.mrb[19].mxu1  ;;  %v904_v63 = vmax.f32 %v634_v51, 0.0 }
 0x111   : > { %v905_v0 = vmax.f32 %v637_v57, 0.0  ;;  %v943_v1 = vmax.f32 %v789_v61, 0.0 }
 0x113   : > { %v1673_v2 = vpack.c.bf16 %v905_v0, %v904_v63  ;;  %v1768_v3 = vpack.c.bf16 %v943_v1, %v942_v60 }
 0x114   : > { %v641_v4 = vpop.f32.mrb[20].mxu0  ;;  %v793_v7 = vpop.f32.mrb[20].mxu1 }
 0x115   : > { %1838 = vst [vmem:[%s2462_s10 + $0x20] sm:$0xff] %v1673_v2   ;;  %v642_v5 = vadd.f32 %v2453_v40, %v641_v4  ;;  %v1936_v6 = vpop.f32.mrb[21].mxu0  ;;  %1857 = vst [vmem:[%s2462_s10 + $0xb8] sm:$0xff] %v1768_v3   ;;  %v794_v9 = vadd.f32 %v2453_v40, %v793_v7  ;;  %v2012_v10 = vpop.f32.mrb[21].mxu1 }
 0x116   : > { %v644_v8 = vpop.f32.mrb[22].mxu0  ;;  %v796_v13 = vpop.f32.mrb[22].mxu1 }
 0x117   : > { %v645_v11 = vadd.f32 %v2453_v40, %v644_v8  ;;  %v1937_v12 = vpop.f32.mrb[23].mxu0  ;;  %v944_v14 = vmax.f32 %v794_v9, 0.0  ;;  %v797_v15 = vadd.f32 %v2453_v40, %v796_v13  ;;  %v2013_v16 = vpop.f32.mrb[23].mxu1  ;;  %v906_v17 = vmax.f32 %v642_v5, 0.0 }
 0x119   : > { %v907_v18 = vmax.f32 %v645_v11, 0.0  ;;  %v945_v19 = vmax.f32 %v797_v15, 0.0 }
 0x11b   : > { %v1678_v20 = vpack.c.bf16 %v907_v18, %v906_v17  ;;  %v1773_v21 = vpack.c.bf16 %v945_v19, %v944_v14 }
 0x11c   : > { %v649_v22 = vpop.f32.mrb[24].mxu0  ;;  %v801_v25 = vpop.f32.mrb[24].mxu1 }
 0x11d   : > { %1839 = vst [vmem:[%s2462_s10 + $0x28] sm:$0xff] %v1678_v20   ;;  %v650_v23 = vadd.f32 %v2453_v40, %v649_v22  ;;  %v1940_v24 = vpop.f32.mrb[25].mxu0  ;;  %1858 = vst [vmem:[%s2462_s10 + $0xc0] sm:$0xff] %v1773_v21   ;;  %v802_v27 = vadd.f32 %v2453_v40, %v801_v25  ;;  %v2016_v28 = vpop.f32.mrb[25].mxu1 }
 0x11e   : > { %v652_v26 = vpop.f32.mrb[26].mxu0  ;;  %v804_v31 = vpop.f32.mrb[26].mxu1 }
 0x11f   : > { %v653_v29 = vadd.f32 %v2453_v40, %v652_v26  ;;  %v1941_v30 = vpop.f32.mrb[27].mxu0  ;;  %v946_v32 = vmax.f32 %v802_v27, 0.0  ;;  %v805_v33 = vadd.f32 %v2453_v40, %v804_v31  ;;  %v2017_v34 = vpop.f32.mrb[27].mxu1  ;;  %v908_v35 = vmax.f32 %v650_v23, 0.0 }
 0x121   : > { %v909_v36 = vmax.f32 %v653_v29, 0.0  ;;  %v947_v37 = vmax.f32 %v805_v33, 0.0 }
 0x123   : > { %v1683_v38 = vpack.c.bf16 %v909_v36, %v908_v35  ;;  %v1778_v39 = vpack.c.bf16 %v947_v37, %v946_v32 }
 0x124   : > { %v657_v41 = vpop.f32.mrb[28].mxu0  ;;  %v809_v44 = vpop.f32.mrb[28].mxu1 }
 0x125   : > { %1840 = vst [vmem:[%s2462_s10 + $0x30] sm:$0xff] %v1683_v38   ;;  %v658_v42 = vadd.f32 %v2453_v40, %v657_v41  ;;  %v1944_v43 = vpop.f32.mrb[29].mxu0  ;;  %1859 = vst [vmem:[%s2462_s10 + $0xc8] sm:$0xff] %v1778_v39   ;;  %v810_v46 = vadd.f32 %v2453_v40, %v809_v44  ;;  %v2020_v47 = vpop.f32.mrb[29].mxu1 }
 0x126   : > { %v660_v45 = vpop.f32.mrb[30].mxu0  ;;  %v812_v50 = vpop.f32.mrb[30].mxu1 }
 0x127   : > { %v661_v48 = vadd.f32 %v2453_v40, %v660_v45  ;;  %v1945_v49 = vpop.f32.mrb[31].mxu0  ;;  %v948_v51 = vmax.f32 %v810_v46, 0.0  ;;  %v813_v52 = vadd.f32 %v2453_v40, %v812_v50  ;;  %v2021_v53 = vpop.f32.mrb[31].mxu1  ;;  %v910_v54 = vmax.f32 %v658_v42, 0.0 }
 0x129   : > { %v911_v55 = vmax.f32 %v661_v48, 0.0  ;;  %v949_v56 = vmax.f32 %v813_v52, 0.0 }
 0x12b   : > { %v1688_v57 = vpack.c.bf16 %v911_v55, %v910_v54  ;;  %v1783_v58 = vpack.c.bf16 %v949_v56, %v948_v51 }
 0x12c   : > { %v665_v59 = vpop.f32.mrb[32].mxu0  ;;  %v817_v62 = vpop.f32.mrb[32].mxu1 }
 0x12d   : > { %1841 = vst [vmem:[%s2462_s10 + $0x38] sm:$0xff] %v1688_v57   ;;  %v666_v60 = vadd.f32 %v2453_v40, %v665_v59  ;;  %v1948_v61 = vpop.f32.mrb[33].mxu0  ;;  %1860 = vst [vmem:[%s2462_s10 + $0xd0] sm:$0xff] %v1783_v58   ;;  %v818_v0 = vadd.f32 %v2453_v40, %v817_v62  ;;  %v2024_v1 = vpop.f32.mrb[33].mxu1 }
 0x12e   : > { %v668_v63 = vpop.f32.mrb[34].mxu0  ;;  %v820_v4 = vpop.f32.mrb[34].mxu1 }
 0x12f   : > { %v669_v2 = vadd.f32 %v2453_v40, %v668_v63  ;;  %v1949_v3 = vpop.f32.mrb[35].mxu0  ;;  %v950_v5 = vmax.f32 %v818_v0, 0.0  ;;  %v821_v6 = vadd.f32 %v2453_v40, %v820_v4  ;;  %v2025_v7 = vpop.f32.mrb[35].mxu1  ;;  %v912_v8 = vmax.f32 %v666_v60, 0.0 }
 0x131   : > { %v913_v9 = vmax.f32 %v669_v2, 0.0  ;;  %v951_v10 = vmax.f32 %v821_v6, 0.0 }
 0x133   : > { %v1693_v11 = vpack.c.bf16 %v913_v9, %v912_v8  ;;  %v1788_v12 = vpack.c.bf16 %v951_v10, %v950_v5 }
 0x134   : > { %v673_v13 = vpop.f32.mrb[36].mxu0  ;;  %v825_v16 = vpop.f32.mrb[36].mxu1 }
 0x135   : > { %1842 = vst [vmem:[%s2462_s10 + $0x40] sm:$0xff] %v1693_v11   ;;  %v674_v14 = vadd.f32 %v2453_v40, %v673_v13  ;;  %v1952_v15 = vpop.f32.mrb[37].mxu0  ;;  %1861 = vst [vmem:[%s2462_s10 + $0xd8] sm:$0xff] %v1788_v12   ;;  %v826_v18 = vadd.f32 %v2453_v40, %v825_v16  ;;  %v2028_v19 = vpop.f32.mrb[37].mxu1 }
 0x136   : > { %v676_v17 = vpop.f32.mrb[38].mxu0  ;;  %v828_v22 = vpop.f32.mrb[38].mxu1 }
 0x137   : > { %v677_v20 = vadd.f32 %v2453_v40, %v676_v17  ;;  %v1953_v21 = vpop.f32.mrb[39].mxu0  ;;  %v952_v23 = vmax.f32 %v826_v18, 0.0  ;;  %v829_v24 = vadd.f32 %v2453_v40, %v828_v22  ;;  %v2029_v25 = vpop.f32.mrb[39].mxu1  ;;  %v914_v26 = vmax.f32 %v674_v14, 0.0 }
 0x139   : > { %v915_v27 = vmax.f32 %v677_v20, 0.0  ;;  %v953_v28 = vmax.f32 %v829_v24, 0.0 }
 0x13b   : > { %v1698_v29 = vpack.c.bf16 %v915_v27, %v914_v26  ;;  %v1793_v30 = vpack.c.bf16 %v953_v28, %v952_v23 }
 0x13c   : > { %v681_v31 = vpop.f32.mrb[40].mxu0  ;;  %v833_v34 = vpop.f32.mrb[40].mxu1 }
 0x13d   : > { %1843 = vst [vmem:[%s2462_s10 + $0x48] sm:$0xff] %v1698_v29   ;;  %v682_v32 = vadd.f32 %v2453_v40, %v681_v31  ;;  %v1956_v33 = vpop.f32.mrb[41].mxu0  ;;  %1862 = vst [vmem:[%s2462_s10 + $0xe0] sm:$0xff] %v1793_v30   ;;  %v834_v36 = vadd.f32 %v2453_v40, %v833_v34  ;;  %v2032_v37 = vpop.f32.mrb[41].mxu1 }
 0x13e   : > { %v684_v35 = vpop.f32.mrb[42].mxu0  ;;  %v836_v41 = vpop.f32.mrb[42].mxu1 }
 0x13f   : > { %v685_v38 = vadd.f32 %v2453_v40, %v684_v35  ;;  %v1957_v39 = vpop.f32.mrb[43].mxu0  ;;  %v954_v42 = vmax.f32 %v834_v36, 0.0  ;;  %v837_v43 = vadd.f32 %v2453_v40, %v836_v41  ;;  %v2033_v44 = vpop.f32.mrb[43].mxu1  ;;  %v916_v45 = vmax.f32 %v682_v32, 0.0 }
 0x141   : > { %v917_v46 = vmax.f32 %v685_v38, 0.0  ;;  %v955_v47 = vmax.f32 %v837_v43, 0.0 }
 0x143   : > { %v1703_v48 = vpack.c.bf16 %v917_v46, %v916_v45  ;;  %v1798_v49 = vpack.c.bf16 %v955_v47, %v954_v42 }
 0x144   : > { %v689_v50 = vpop.f32.mrb[44].mxu0  ;;  %v841_v53 = vpop.f32.mrb[44].mxu1 }
 0x145   : > { %1844 = vst [vmem:[%s2462_s10 + $0x50] sm:$0xff] %v1703_v48   ;;  %v690_v51 = vadd.f32 %v2453_v40, %v689_v50  ;;  %v1960_v52 = vpop.f32.mrb[45].mxu0  ;;  %1863 = vst [vmem:[%s2462_s10 + $0xe8] sm:$0xff] %v1798_v49   ;;  %v842_v55 = vadd.f32 %v2453_v40, %v841_v53  ;;  %v2036_v56 = vpop.f32.mrb[45].mxu1 }
 0x146   : > { %v692_v54 = vpop.f32.mrb[46].mxu0  ;;  %v844_v59 = vpop.f32.mrb[46].mxu1 }
 0x147   : > { %v693_v57 = vadd.f32 %v2453_v40, %v692_v54  ;;  %v1961_v58 = vpop.f32.mrb[47].mxu0  ;;  %v956_v60 = vmax.f32 %v842_v55, 0.0  ;;  %v845_v61 = vadd.f32 %v2453_v40, %v844_v59  ;;  %v2037_v62 = vpop.f32.mrb[47].mxu1  ;;  %v918_v63 = vmax.f32 %v690_v51, 0.0 }
 0x149   : > { %v919_v0 = vmax.f32 %v693_v57, 0.0  ;;  %v957_v1 = vmax.f32 %v845_v61, 0.0 }
 0x14b   : > { %v1708_v2 = vpack.c.bf16 %v919_v0, %v918_v63  ;;  %v1803_v3 = vpack.c.bf16 %v957_v1, %v956_v60 }
 0x14c   : > { %v697_v4 = vpop.f32.mrb[48].mxu0  ;;  %v849_v7 = vpop.f32.mrb[48].mxu1 }
 0x14d   : > { %1845 = vst [vmem:[%s2462_s10 + $0x58] sm:$0xff] %v1708_v2   ;;  %v698_v5 = vadd.f32 %v2453_v40, %v697_v4  ;;  %v1964_v6 = vpop.f32.mrb[49].mxu0  ;;  %1864 = vst [vmem:[%s2462_s10 + $0xf0] sm:$0xff] %v1803_v3   ;;  %v850_v9 = vadd.f32 %v2453_v40, %v849_v7  ;;  %v2040_v10 = vpop.f32.mrb[49].mxu1 }
 0x14e   : > { %v700_v8 = vpop.f32.mrb[50].mxu0  ;;  %v852_v13 = vpop.f32.mrb[50].mxu1 }
 0x14f   : > { %v701_v11 = vadd.f32 %v2453_v40, %v700_v8  ;;  %v1965_v12 = vpop.f32.mrb[51].mxu0  ;;  %v958_v14 = vmax.f32 %v850_v9, 0.0  ;;  %v853_v15 = vadd.f32 %v2453_v40, %v852_v13  ;;  %v2041_v16 = vpop.f32.mrb[51].mxu1  ;;  %v920_v17 = vmax.f32 %v698_v5, 0.0 }
 0x151   : > { %v921_v18 = vmax.f32 %v701_v11, 0.0  ;;  %v959_v19 = vmax.f32 %v853_v15, 0.0 }
 0x153   : > { %v1713_v20 = vpack.c.bf16 %v921_v18, %v920_v17  ;;  %v1808_v21 = vpack.c.bf16 %v959_v19, %v958_v14 }
 0x154   : > { %v705_v22 = vpop.f32.mrb[52].mxu0  ;;  %v857_v25 = vpop.f32.mrb[52].mxu1 }
 0x155   : > { %1846 = vst [vmem:[%s2462_s10 + $0x60] sm:$0xff] %v1713_v20   ;;  %v706_v23 = vadd.f32 %v2453_v40, %v705_v22  ;;  %v1968_v24 = vpop.f32.mrb[53].mxu0  ;;  %1865 = vst [vmem:[%s2462_s10 + $0xf8] sm:$0xff] %v1808_v21   ;;  %v858_v27 = vadd.f32 %v2453_v40, %v857_v25  ;;  %v2044_v28 = vpop.f32.mrb[53].mxu1 }
 0x156   : > { %v708_v26 = vpop.f32.mrb[54].mxu0  ;;  %v860_v31 = vpop.f32.mrb[54].mxu1 }
 0x157   : > { %v709_v29 = vadd.f32 %v2453_v40, %v708_v26  ;;  %v1969_v30 = vpop.f32.mrb[55].mxu0  ;;  %v960_v32 = vmax.f32 %v858_v27, 0.0  ;;  %v861_v33 = vadd.f32 %v2453_v40, %v860_v31  ;;  %v2045_v34 = vpop.f32.mrb[55].mxu1  ;;  %v922_v35 = vmax.f32 %v706_v23, 0.0 }
 0x159   : > { %v923_v36 = vmax.f32 %v709_v29, 0.0  ;;  %v961_v37 = vmax.f32 %v861_v33, 0.0 }
 0x15b   : > { %v1718_v38 = vpack.c.bf16 %v923_v36, %v922_v35  ;;  %v1813_v39 = vpack.c.bf16 %v961_v37, %v960_v32 }
 0x15c   : > { %v713_v41 = vpop.f32.mrb[56].mxu0  ;;  %v865_v44 = vpop.f32.mrb[56].mxu1 }
 0x15d   : > { %1847 = vst [vmem:[%s2462_s10 + $0x68] sm:$0xff] %v1718_v38   ;;  %v714_v42 = vadd.f32 %v2453_v40, %v713_v41  ;;  %v1972_v43 = vpop.f32.mrb[57].mxu0  ;;  %1866 = vst [vmem:[%s2462_s10 + $0x100] sm:$0xff] %v1813_v39   ;;  %v866_v46 = vadd.f32 %v2453_v40, %v865_v44  ;;  %v2048_v47 = vpop.f32.mrb[57].mxu1 }
 0x15e   : > { %v716_v45 = vpop.f32.mrb[58].mxu0  ;;  %v868_v50 = vpop.f32.mrb[58].mxu1 }
 0x15f   : > { %v717_v48 = vadd.f32 %v2453_v40, %v716_v45  ;;  %v1973_v49 = vpop.f32.mrb[59].mxu0  ;;  %v962_v51 = vmax.f32 %v866_v46, 0.0  ;;  %v869_v52 = vadd.f32 %v2453_v40, %v868_v50  ;;  %v2049_v53 = vpop.f32.mrb[59].mxu1  ;;  %v924_v54 = vmax.f32 %v714_v42, 0.0 }
 0x161   : > { %v925_v55 = vmax.f32 %v717_v48, 0.0  ;;  %v963_v56 = vmax.f32 %v869_v52, 0.0 }
 0x163   : > { %v1723_v57 = vpack.c.bf16 %v925_v55, %v924_v54  ;;  %v1818_v58 = vpack.c.bf16 %v963_v56, %v962_v51 }
 0x164   : > { %v721_v59 = vpop.f32.mrb[60].mxu0  ;;  %v873_v62 = vpop.f32.mrb[60].mxu1 }
 0x165   : > { %1848 = vst [vmem:[%s2462_s10 + $0x70] sm:$0xff] %v1723_v57   ;;  %v722_v60 = vadd.f32 %v2453_v40, %v721_v59  ;;  %v1976_v61 = vpop.f32.mrb[61].mxu0  ;;  %1867 = vst [vmem:[%s2462_s10 + $0x108] sm:$0xff] %v1818_v58   ;;  %v874_v0 = vadd.f32 %v2453_v40, %v873_v62  ;;  %v2052_v1 = vpop.f32.mrb[61].mxu1 }
 0x166   : > { %v724_v63 = vpop.f32.mrb[62].mxu0  ;;  %v876_v4 = vpop.f32.mrb[62].mxu1 }
 0x167   : > { %v725_v2 = vadd.f32 %v2453_v40, %v724_v63  ;;  %v1977_v3 = vpop.f32.mrb[63].mxu0  ;;  %v964_v5 = vmax.f32 %v874_v0, 0.0  ;;  %v877_v6 = vadd.f32 %v2453_v40, %v876_v4  ;;  %v2053_v7 = vpop.f32.mrb[63].mxu1  ;;  %v926_v8 = vmax.f32 %v722_v60, 0.0 }
 0x169   : > { %v927_v9 = vmax.f32 %v725_v2, 0.0  ;;  %v965_v10 = vmax.f32 %v877_v6, 0.0 }
 0x16b   : > { %v1728_v11 = vpack.c.bf16 %v927_v9, %v926_v8  ;;  %v1823_v12 = vpack.c.bf16 %v965_v10, %v964_v5 }
 0x16c   : > { %v729_v13 = vpop.f32.mrb[64].mxu0  ;;  %v881_v16 = vpop.f32.mrb[64].mxu1 }
 0x16d   : > { %1849 = vst [vmem:[%s2462_s10 + $0x78] sm:$0xff] %v1728_v11   ;;  %v730_v14 = vadd.f32 %v2453_v40, %v729_v13  ;;  %v1980_v15 = vpop.f32.mrb[65].mxu0  ;;  %1868 = vst [vmem:[%s2462_s10 + $0x110] sm:$0xff] %v1823_v12   ;;  %v882_v18 = vadd.f32 %v2453_v40, %v881_v16  ;;  %v2056_v19 = vpop.f32.mrb[65].mxu1 }
 0x16e   : > { %v732_v17 = vpop.f32.mrb[66].mxu0  ;;  %v884_v22 = vpop.f32.mrb[66].mxu1 }
 0x16f   : > { %v733_v20 = vadd.f32 %v2453_v40, %v732_v17  ;;  %v1981_v21 = vpop.f32.mrb[67].mxu0  ;;  %v966_v23 = vmax.f32 %v882_v18, 0.0  ;;  %v885_v24 = vadd.f32 %v2453_v40, %v884_v22  ;;  %v2057_v25 = vpop.f32.mrb[67].mxu1  ;;  %v928_v26 = vmax.f32 %v730_v14, 0.0 }
 0x171   : > { %v929_v27 = vmax.f32 %v733_v20, 0.0  ;;  %v967_v28 = vmax.f32 %v885_v24, 0.0 }
 0x173   : > { %v1733_v29 = vpack.c.bf16 %v929_v27, %v928_v26  ;;  %v1828_v30 = vpack.c.bf16 %v967_v28, %v966_v23 }
 0x174   : > { %v737_v31 = vpop.f32.mrb[68].mxu0  ;;  %v889_v34 = vpop.f32.mrb[68].mxu1 }
 0x175   : > { %1850 = vst [vmem:[%s2462_s10 + $0x80] sm:$0xff] %v1733_v29   ;;  %v738_v32 = vadd.f32 %v2453_v40, %v737_v31  ;;  %v1984_v33 = vpop.f32.mrb[69].mxu0  ;;  %1869 = vst [vmem:[%s2462_s10 + $0x118] sm:$0xff] %v1828_v30   ;;  %v890_v36 = vadd.f32 %v2453_v40, %v889_v34  ;;  %v2060_v37 = vpop.f32.mrb[69].mxu1 }
 0x176   : > { %v740_v35 = vpop.f32.mrb[70].mxu0  ;;  %v892_v41 = vpop.f32.mrb[70].mxu1 }
 0x177   : > { %v741_v38 = vadd.f32 %v2453_v40, %v740_v35  ;;  %v1985_v39 = vpop.f32.mrb[71].mxu0  ;;  %v968_v42 = vmax.f32 %v890_v36, 0.0  ;;  %v893_v43 = vadd.f32 %v2453_v40, %v892_v41  ;;  %v2061_v44 = vpop.f32.mrb[71].mxu1  ;;  %v930_v45 = vmax.f32 %v738_v32, 0.0 }
 0x179   : > { %v931_v46 = vmax.f32 %v741_v38, 0.0  ;;  %v969_v47 = vmax.f32 %v893_v43, 0.0 }
 0x17b   : > { %v1738_v48 = vpack.c.bf16 %v931_v46, %v930_v45  ;;  %v1833_v49 = vpack.c.bf16 %v969_v47, %v968_v42 }
 0x17c   : > { %v745_v50 = vpop.f32.mrb[72].mxu0 }
 0x17d   : > { %1851 = vst [vmem:[%s2462_s10 + $0x88] sm:$0xff] %v1738_v48   ;;  %v746_v51 = vadd.f32 %v2453_v40, %v745_v50  ;;  %v1988_v52 = vpop.f32.mrb[73].mxu0  ;;  %1870 = vst [vmem:[%s2462_s10 + $0x120] sm:$0xff] %v1833_v49  }
 0x17e   : > { %v748_v53 = vpop.f32.mrb[74].mxu0 }
 0x17f   : > { %v749_v54 = vadd.f32 %v2453_v40, %v748_v53  ;;  %v1989_v55 = vpop.f32.mrb[75].mxu0  ;;  %v932_v56 = vmax.f32 %v746_v51, 0.0 }
 0x181   : > { %v933_v57 = vmax.f32 %v749_v54, 0.0 }
 0x183   : > { %v1743_v58 = vpack.c.bf16 %v933_v57, %v932_v56 }
 0x185   : > { %1852 = vst [vmem:[%s2462_s10 + $0x90] sm:$0xff] %v1743_v58  }
 0x186   : > { %2162 = shalt.err (!%p2159_p3)
}
 0x187   : > { %s2163_s29 = scalar_lea.hbm %s2575_s24, 4736  ;;  %s2167_s5 = scalar_lea.hbm %s2626_s3, 18944 }
 0x188   : > { %p2164_p4 = scmp.ne.s32.totalorder %s2575_s24, %s2163_s29  ;;  %p2168_p9 = scmp.lt.u32.totalorder %s2575_s24, %s2626_s3 }
 0x189   : > { %p2169_p10 = scmp.lt.u32.totalorder %s2167_s5, %s2163_s29  ;;  %p2171_p12 = scmp.lt.u32.totalorder %s2163_s29, %s2575_s24 }
 0x18a   : > { %p2165_p7 = pnand %p2164_p4, %p2276_p5 }
 0x18b   : > { %p2170_p11 = por %p2169_p10, %p2168_p9 }
 0x18c   : > { %p2166_p8 = pneg %p2165_p7 }
 0x18d   : > { %p2172_p13 = por %p2171_p12, %p2170_p11 }
 0x18f   : > { %p2173_p0 = pnand %p2172_p13, %p2166_p8 }
 0x191   : > { %2176 = shalt.err (!%p2173_p0)
}
 0x192   : > { %s2216_s8 = smov 64   ;;  %s2217_s9 = smov 4  }
 0x193   : > { %2067 = dma.vmem_to_hbm [thread:$0]  (%p2276_p5), %s2577_s17, 4736, %s2575_s24, %s2582_s16, %s2216_s8, %s2216_s8, %s2217_s9  }
 0x194 PF: > { %p2073_p1 = scmp.ge.s32.totalorder %s2211_s15, 2  ;;  %s1369_s10 = sand.u32 1, %s2199_s12  }
 0x195   : > { %s1370_s11 = scalar_lea.sflag [#allocation3], %s1369_s10 }
 0x196   : > { %p2070_p2 = pnand %p2073_p1, %p2280_p6 }
 0x198   : > { %2194 = dma.done.wait (!%p2070_p2), %s1370_s11, 4736  }
 0x199   : > { %2196 = vsyncadd (!%p2070_p2), %s1370_s11, 4294962560  ;;  %p13_p3 = scmp.ge.s32.totalorder %s2263_s18, 6   ;;  %s2629_s12 = smov %s2203_s13 }
 0x19a   : > { %s2630_s13 = smov %s2207_s14  ;;  %s2631_s14 = smov %s2274_s21 }
 0x19b   : > { %s2632_s15 = smov %s2263_s18  ;;  %15 = sbr.rel (!%p13_p3) target bundleno = 3 (0x3), region = 67 }
 0x1a2   :  { %1375 = vsyncpa [#allocation3], 1 }
 0x1a3   :  { %1377 = vsyncpa [#allocation3 + $0x1], 1 }

</bundles_post_ra>
